<compile_context>
chip_gen: v7x
topology: tpu7x:2x2x1
jax: 0.10.0
libtpu: 0.0.40
codegen_flags: <defaults>
</compile_context>

<pallas_src>
import functools

import jax
import jax.numpy as jnp
from jax.experimental import pallas as pl
from jax.experimental.pallas import tpu as pltpu


def _round_up(x, m):
    return ((x + m - 1) // m) * m


def _rotl32(x, r):
    return jax.lax.shift_left(x, jnp.uint32(r)) | jax.lax.shift_right_logical(
        x, jnp.uint32(32 - r))


def _murmur3_2word(seed_u32, k1, k2):
    """murmur3_32 of the two 32-bit words (k1, k2) with seed `seed_u32`."""
    c1 = jnp.uint32(0xCC9E2D51)
    c2 = jnp.uint32(0x1B873593)

    def mix(h, k):
        k = k * c1
        k = _rotl32(k, 15)
        k = k * c2
        h = h ^ k
        h = _rotl32(h, 13)
        h = h * jnp.uint32(5) + jnp.uint32(0xE6546B64)
        return h

    h = mix(seed_u32, k1)
    h = mix(h, k2)
    h = h ^ jnp.uint32(8)                                   # "length" in bytes
    h = h ^ jax.lax.shift_right_logical(h, jnp.uint32(16))
    h = h * jnp.uint32(0x85EBCA6B)
    h = h ^ jax.lax.shift_right_logical(h, jnp.uint32(13))
    h = h * jnp.uint32(0xC2B2AE35)
    h = h ^ jax.lax.shift_right_logical(h, jnp.uint32(16))
    return h


def _embedding_gather_kernel(seed_ref, ids_ref, *refs, rows, tok_tile, d_pad,
                             dropout_p, training):
    """Gathers `rows` embedding rows per step; optional inverted dropout."""
    del ids_ref  # ids are consumed by the table index_maps (the gather)
    row_refs = refs[:rows]
    out_ref = refs[rows]

    j = pl.program_id(1)                       # R-row chunk inside the tile
    base = pl.multiple_of(j * rows, rows)      # sublane-aligned row offset

    # Deposit the gathered rows into the VMEM-resident (tok_tile, d_pad)
    # output tile; it is written back to HBM once per tile, lane-dense.
    for r in range(rows):                      # static unroll
        out_ref[pl.ds(base + r, 1), :] = row_refs[r][0].astype(out_ref.dtype)

    if not (training and dropout_p > 0.0):
        return

    keep_prob = 1.0 - float(dropout_p)
    if keep_prob <= 0.0:                       # nn.Dropout(p=1) zeroes output
        out_ref[pl.ds(base, rows), :] = jnp.zeros((rows, d_pad), out_ref.dtype)
        return

    # Stateless, reproducible dropout over the whole (rows, d_pad) slab at
    # once: murmur3(seed; global_token_index, dim) -> 23-bit uniform,
    # keep/drop decided in the integer domain (no int->float converts).
    i = pl.program_id(0)
    tok0 = (i * tok_tile + base).astype(jnp.uint32)
    tok = tok0 + jax.lax.broadcasted_iota(jnp.uint32, (rows, d_pad), 0)
    dim = jax.lax.broadcasted_iota(jnp.uint32, (rows, d_pad), 1)
    h = _murmur3_2word(seed_ref[0].astype(jnp.uint32), tok, dim)
    thresh = jnp.uint32(min(1 << 23, int(round(keep_prob * (1 << 23)))))
    keep = (h & jnp.uint32(0x7FFFFF)) < thresh

    slab = out_ref[pl.ds(base, rows), :].astype(jnp.float32)
    slab = jnp.where(keep, slab * jnp.float32(1.0 / keep_prob), 0.0)
    out_ref[pl.ds(base, rows), :] = slab.astype(out_ref.dtype)


def embeddings_forward(ids, table, *, dropout_p=0.1, training=True,
                       seed=0, tok_tile=256):
    """Pallas forward for Embeddings: dropout(embedding_table[ids])."""
    B, S = ids.shape
    V, D = table.shape
    N = B * S
    itemsize = jnp.dtype(table.dtype).itemsize

    # Rows gathered per inner grid step: fill a vreg's sublanes
    # (8 for 4-byte dtypes, 16 for bf16/fp16, 32 for 1-byte dtypes).
    rows = max(8, 32 // max(1, itemsize))

    # Lane-dense embedding dim (multiple of 128) for unmasked vector stores.
    d_pad = _round_up(D, 128)

    # Token tile whose output rows stay VMEM-resident across the inner axis.
    tok_tile = max(rows, min(int(tok_tile), _round_up(N, rows)))
    tok_tile = _round_up(tok_tile, rows)
    # v7x megacore: keep >= 2 outer ("parallel") tiles whenever N allows it.
    if _round_up(N, rows) >= 2 * rows and _round_up(N, tok_tile) // tok_tile < 2:
        tok_tile = _round_up(pl.cdiv(N, 2), rows)
    n_pad = _round_up(N, tok_tile)

    # Flatten, clamp, pad the ids.
    # TODO(synk): torch.nn.Embedding raises on out-of-range ids; here they are
    # clamped so the data-dependent gather can never read out of bounds.
    ids_flat = jnp.clip(ids.reshape(-1).astype(jnp.int32), 0, V - 1)
    if n_pad != N:
        ids_flat = jnp.concatenate(
            [ids_flat, jnp.zeros((n_pad - N,), jnp.int32)])
    # TODO(synk): for very large N (>~256K tokens) the scalar-prefetched ids
    # should be chunked across several pallas_calls to respect the SMEM budget.

    seed_arr = jnp.asarray([seed], dtype=jnp.int32)

    table_p = table if d_pad == D else jnp.pad(table, ((0, 0), (0, d_pad - D)))
    # (V, 1, d_pad) row blocks of shape (1, 1, d_pad): only looked-up rows are
    # DMA'd HBM -> VMEM; the table itself never has to fit in VMEM.
    table3 = table_p.reshape(V, 1, d_pad)

    grid = (n_pad // tok_tile, tok_tile // rows)

    def _row_spec(r):
        # `rows` independent gathers per step; each operand is double-buffered
        # by the pipeline, so 2*rows row DMAs can be in flight at once.
        return pl.BlockSpec(
            (1, 1, d_pad),
            lambda i, j, seed_ref, ids_ref, r=r:
                (ids_ref[i * tok_tile + j * rows + r], 0, 0))

    kernel = functools.partial(
        _embedding_gather_kernel, rows=rows, tok_tile=tok_tile, d_pad=d_pad,
        dropout_p=float(dropout_p), training=bool(training))

    out_bytes = n_pad * d_pad * itemsize
    cost = pl.CostEstimate(flops=0, transcendentals=0,
                           bytes_accessed=2 * out_bytes + n_pad * 4)

    vmem_need = (2 * tok_tile * d_pad * itemsize        # out tile, dbl-buffered
                 + 2 * rows * d_pad * itemsize          # gathered-row buffers
                 + (1 << 20))                           # headroom
    vmem_limit = int(min(max(2 * vmem_need, 16 * 1024 * 1024),
                         48 * 1024 * 1024))             # safe on v7x (64 MiB)

    out = pl.pallas_call(
        kernel,
        out_shape=jax.ShapeDtypeStruct((n_pad, d_pad), table.dtype),
        grid_spec=pltpu.PrefetchScalarGridSpec(
            num_scalar_prefetch=2,          # seed, token ids -> SMEM
            grid=grid,
            in_specs=[_row_spec(r) for r in range(rows)],
            out_specs=pl.BlockSpec((tok_tile, d_pad),
                                   lambda i, j, seed_ref, ids_ref: (i, 0)),
        ),
        compiler_params=pltpu.CompilerParams(
            dimension_semantics=("parallel", "arbitrary"),
            vmem_limit_bytes=vmem_limit),
        cost_estimate=cost,
    )(seed_arr, ids_flat, *([table3] * rows))

    return out[:N, :D].reshape(B, S, D)


def make_embedding_table(key, vocab_size, d_model, pad_token=None):
    """Init matching nn.Embedding: N(0, 1) weights, padding row zeroed."""
    # TODO(synk): padding_idx only zero-inits the row here (forward-equivalent);
    # nn.Embedding additionally masks its gradient in the backward pass.
    table = jax.random.normal(key, (vocab_size, d_model), dtype=jnp.float32)
    if pad_token is not None:
        table = table.at[pad_token].set(0.0)
    return table


if __name__ == "__main__":
    # Small shapes consistent with the module's forward pass.
    d_model = 32
    vocab_size = 32
    dropout_p = 0.1
    pad_token = 0
    B, S = 2, 8

    root = jax.random.PRNGKey(0)
    k_table, k_ids = jax.random.split(root)

    table = make_embedding_table(k_table, vocab_size, d_model, pad_token)
    ids = jax.random.randint(k_ids, (B, S), 0, vocab_size, dtype=jnp.int32)
    ref = table[ids]

    # Eval mode: dropout is identity -> must match a plain gather exactly.
    out_eval = jax.block_until_ready(
        embeddings_forward(ids, table, dropout_p=dropout_p, training=False))
    assert out_eval.shape == (B, S, d_model)
    assert jnp.allclose(out_eval, ref, atol=1e-6, rtol=1e-6)

    # Training mode: inverted dropout.  Every element is either exactly 0
    # (dropped) or ref / keep_prob (kept).
    out_train = jax.block_until_ready(
        embeddings_forward(ids, table, dropout_p=dropout_p, training=True,
                           seed=123))
    assert out_train.shape == (B, S, d_model)
    assert bool(jnp.all(jnp.isfinite(out_train)))
    keep_prob = 1.0 - dropout_p
    scaled_ref = ref / keep_prob
    ok = jnp.isclose(out_train, scaled_ref, atol=1e-5, rtol=1e-5) | (out_train == 0)
    assert bool(jnp.all(ok))

    # Drop-rate sanity check restricted to elements whose reference value is
    # nonzero (excludes the zeroed padding row, which would otherwise be
    # indistinguishable from dropped elements).
    nz = ref != 0
    n_nz = int(jnp.sum(nz))
    if n_nz > 0:
        drop_frac = float(jnp.sum((out_train == 0) & nz)) / n_nz
        assert 0.0 < drop_frac < 0.35, drop_frac

    print("KERNEL_OK")
</pallas_src>

<mosaic_0001>
module attributes {stable_mosaic.version = 11 : i64} {
  func.func @_embedding_gather_kernel(%arg0: i32, %arg1: i32, %arg2: memref<1xi32, #tpu.memory_space<smem>>, %arg3: memref<16xi32, #tpu.memory_space<smem>>, %arg4: memref<1x1x128xf32, #tpu.memory_space<vmem>>, %arg5: memref<1x1x128xf32, #tpu.memory_space<vmem>>, %arg6: memref<1x1x128xf32, #tpu.memory_space<vmem>>, %arg7: memref<1x1x128xf32, #tpu.memory_space<vmem>>, %arg8: memref<1x1x128xf32, #tpu.memory_space<vmem>>, %arg9: memref<1x1x128xf32, #tpu.memory_space<vmem>>, %arg10: memref<1x1x128xf32, #tpu.memory_space<vmem>>, %arg11: memref<1x1x128xf32, #tpu.memory_space<vmem>>, %arg12: memref<8x128xf32, #tpu.memory_space<vmem>>) attributes {dimension_semantics = [#tpu.dimension_semantics<parallel>, #tpu.dimension_semantics<arbitrary>], iteration_bounds = array<i64: 2, 1>, scalar_prefetch = 2 : i64, scratch_operands = 0 : i64, tpu.core_type = #tpu.core_type<tc>, window_params = [{transform_indices = @transform_0, window_bounds = array<i64: 1, 1, 128>}, {transform_indices = @transform_1, window_bounds = array<i64: 1, 1, 128>}, {transform_indices = @transform_2, window_bounds = array<i64: 1, 1, 128>}, {transform_indices = @transform_3, window_bounds = array<i64: 1, 1, 128>}, {transform_indices = @transform_4, window_bounds = array<i64: 1, 1, 128>}, {transform_indices = @transform_5, window_bounds = array<i64: 1, 1, 128>}, {transform_indices = @transform_6, window_bounds = array<i64: 1, 1, 128>}, {transform_indices = @transform_7, window_bounds = array<i64: 1, 1, 128>}, {transform_indices = @transform_8, window_bounds = array<i64: 8, 128>}]} {
    %c8_i32 = arith.constant 8 : i32
    %0 = arith.muli %arg1, %c8_i32 : i32
    %1 = tpu.assume_multiple %0, 8 : i32
    %c0 = arith.constant 0 : index
    %c0_0 = arith.constant 0 : index
    %c0_1 = arith.constant 0 : index
    %2 = vector.load %arg4[%c0, %c0_0, %c0_1] : memref<1x1x128xf32, #tpu.memory_space<vmem>>, vector<1x1x128xf32>
    %3 = vector.shape_cast %2 : vector<1x1x128xf32> to vector<1x128xf32>
    %c0_i32 = arith.constant 0 : i32
    %4 = arith.addi %1, %c0_i32 : i32
    %5 = arith.index_cast %4 : i32 to index
    %c0_2 = arith.constant 0 : index
    %6 = vector.load %arg12[%5, %c0_2] : memref<8x128xf32, #tpu.memory_space<vmem>>, vector<1x128xf32>
    tpu.vector_store %arg12[%5, %c0_2], %3 {strides = array<i32>} : memref<8x128xf32, #tpu.memory_space<vmem>>, vector<1x128xf32>,
    %c0_3 = arith.constant 0 : index
    %c0_4 = arith.constant 0 : index
    %c0_5 = arith.constant 0 : index
    %7 = vector.load %arg5[%c0_3, %c0_4, %c0_5] : memref<1x1x128xf32, #tpu.memory_space<vmem>>, vector<1x1x128xf32>
    %8 = vector.shape_cast %7 : vector<1x1x128xf32> to vector<1x128xf32>
    %c1_i32 = arith.constant 1 : i32
    %9 = arith.addi %1, %c1_i32 : i32
    %10 = arith.index_cast %9 : i32 to index
    %c0_6 = arith.constant 0 : index
    %11 = vector.load %arg12[%10, %c0_6] : memref<8x128xf32, #tpu.memory_space<vmem>>, vector<1x128xf32>
    tpu.vector_store %arg12[%10, %c0_6], %8 {strides = array<i32>} : memref<8x128xf32, #tpu.memory_space<vmem>>, vector<1x128xf32>,
    %c0_7 = arith.constant 0 : index
    %c0_8 = arith.constant 0 : index
    %c0_9 = arith.constant 0 : index
    %12 = vector.load %arg6[%c0_7, %c0_8, %c0_9] : memref<1x1x128xf32, #tpu.memory_space<vmem>>, vector<1x1x128xf32>
    %13 = vector.shape_cast %12 : vector<1x1x128xf32> to vector<1x128xf32>
    %c2_i32 = arith.constant 2 : i32
    %14 = arith.addi %1, %c2_i32 : i32
    %15 = arith.index_cast %14 : i32 to index
    %c0_10 = arith.constant 0 : index
    %16 = vector.load %arg12[%15, %c0_10] : memref<8x128xf32, #tpu.memory_space<vmem>>, vector<1x128xf32>
    tpu.vector_store %arg12[%15, %c0_10], %13 {strides = array<i32>} : memref<8x128xf32, #tpu.memory_space<vmem>>, vector<1x128xf32>,
    %c0_11 = arith.constant 0 : index
    %c0_12 = arith.constant 0 : index
    %c0_13 = arith.constant 0 : index
    %17 = vector.load %arg7[%c0_11, %c0_12, %c0_13] : memref<1x1x128xf32, #tpu.memory_space<vmem>>, vector<1x1x128xf32>
    %18 = vector.shape_cast %17 : vector<1x1x128xf32> to vector<1x128xf32>
    %c3_i32 = arith.constant 3 : i32
    %19 = arith.addi %1, %c3_i32 : i32
    %20 = arith.index_cast %19 : i32 to index
    %c0_14 = arith.constant 0 : index
    %21 = vector.load %arg12[%20, %c0_14] : memref<8x128xf32, #tpu.memory_space<vmem>>, vector<1x128xf32>
    tpu.vector_store %arg12[%20, %c0_14], %18 {strides = array<i32>} : memref<8x128xf32, #tpu.memory_space<vmem>>, vector<1x128xf32>,
    %c0_15 = arith.constant 0 : index
    %c0_16 = arith.constant 0 : index
    %c0_17 = arith.constant 0 : index
    %22 = vector.load %arg8[%c0_15, %c0_16, %c0_17] : memref<1x1x128xf32, #tpu.memory_space<vmem>>, vector<1x1x128xf32>
    %23 = vector.shape_cast %22 : vector<1x1x128xf32> to vector<1x128xf32>
    %c4_i32 = arith.constant 4 : i32
    %24 = arith.addi %1, %c4_i32 : i32
    %25 = arith.index_cast %24 : i32 to index
    %c0_18 = arith.constant 0 : index
    %26 = vector.load %arg12[%25, %c0_18] : memref<8x128xf32, #tpu.memory_space<vmem>>, vector<1x128xf32>
    tpu.vector_store %arg12[%25, %c0_18], %23 {strides = array<i32>} : memref<8x128xf32, #tpu.memory_space<vmem>>, vector<1x128xf32>,
    %c0_19 = arith.constant 0 : index
    %c0_20 = arith.constant 0 : index
    %c0_21 = arith.constant 0 : index
    %27 = vector.load %arg9[%c0_19, %c0_20, %c0_21] : memref<1x1x128xf32, #tpu.memory_space<vmem>>, vector<1x1x128xf32>
    %28 = vector.shape_cast %27 : vector<1x1x128xf32> to vector<1x128xf32>
    %c5_i32 = arith.constant 5 : i32
    %29 = arith.addi %1, %c5_i32 : i32
    %30 = arith.index_cast %29 : i32 to index
    %c0_22 = arith.constant 0 : index
    %31 = vector.load %arg12[%30, %c0_22] : memref<8x128xf32, #tpu.memory_space<vmem>>, vector<1x128xf32>
    tpu.vector_store %arg12[%30, %c0_22], %28 {strides = array<i32>} : memref<8x128xf32, #tpu.memory_space<vmem>>, vector<1x128xf32>,
    %c0_23 = arith.constant 0 : index
    %c0_24 = arith.constant 0 : index
    %c0_25 = arith.constant 0 : index
    %32 = vector.load %arg10[%c0_23, %c0_24, %c0_25] : memref<1x1x128xf32, #tpu.memory_space<vmem>>, vector<1x1x128xf32>
    %33 = vector.shape_cast %32 : vector<1x1x128xf32> to vector<1x128xf32>
    %c6_i32 = arith.constant 6 : i32
    %34 = arith.addi %1, %c6_i32 : i32
    %35 = arith.index_cast %34 : i32 to index
    %c0_26 = arith.constant 0 : index
    %36 = vector.load %arg12[%35, %c0_26] : memref<8x128xf32, #tpu.memory_space<vmem>>, vector<1x128xf32>
    tpu.vector_store %arg12[%35, %c0_26], %33 {strides = array<i32>} : memref<8x128xf32, #tpu.memory_space<vmem>>, vector<1x128xf32>,
    %c0_27 = arith.constant 0 : index
    %c0_28 = arith.constant 0 : index
    %c0_29 = arith.constant 0 : index
    %37 = vector.load %arg11[%c0_27, %c0_28, %c0_29] : memref<1x1x128xf32, #tpu.memory_space<vmem>>, vector<1x1x128xf32>
    %38 = vector.shape_cast %37 : vector<1x1x128xf32> to vector<1x128xf32>
    %c7_i32 = arith.constant 7 : i32
    %39 = arith.addi %1, %c7_i32 : i32
    %40 = arith.index_cast %39 : i32 to index
    %c0_30 = arith.constant 0 : index
    %41 = vector.load %arg12[%40, %c0_30] : memref<8x128xf32, #tpu.memory_space<vmem>>, vector<1x128xf32>
    tpu.vector_store %arg12[%40, %c0_30], %38 {strides = array<i32>} : memref<8x128xf32, #tpu.memory_space<vmem>>, vector<1x128xf32>,
    return
  }
  func.func @transform_0(%arg0: i32, %arg1: i32, %arg2: memref<1xi32, #tpu.memory_space<smem>>, %arg3: memref<16xi32, #tpu.memory_space<smem>>) -> (i32, i32, i32) {
    %c8_i32 = arith.constant 8 : i32
    %0 = arith.muli %arg0, %c8_i32 : i32
    %c8_i32_0 = arith.constant 8 : i32
    %1 = arith.muli %arg1, %c8_i32_0 : i32
    %2 = arith.addi %0, %1 : i32
    %c0_i32 = arith.constant 0 : i32
    %3 = arith.addi %2, %c0_i32 : i32
    %4 = arith.index_cast %3 : i32 to index
    %5 = memref.load %arg3[%4] : memref<16xi32, #tpu.memory_space<smem>>
    %c0_i32_1 = arith.constant 0 : i32
    %c0_i32_2 = arith.constant 0 : i32
    %c0_i32_3 = arith.constant 0 : i32
    return %5, %c0_i32_1, %c0_i32_2 : i32, i32, i32
  }
  func.func @transform_1(%arg0: i32, %arg1: i32, %arg2: memref<1xi32, #tpu.memory_space<smem>>, %arg3: memref<16xi32, #tpu.memory_space<smem>>) -> (i32, i32, i32) {
    %c8_i32 = arith.constant 8 : i32
    %0 = arith.muli %arg0, %c8_i32 : i32
    %c8_i32_0 = arith.constant 8 : i32
    %1 = arith.muli %arg1, %c8_i32_0 : i32
    %2 = arith.addi %0, %1 : i32
    %c1_i32 = arith.constant 1 : i32
    %3 = arith.addi %2, %c1_i32 : i32
    %4 = arith.index_cast %3 : i32 to index
    %5 = memref.load %arg3[%4] : memref<16xi32, #tpu.memory_space<smem>>
    %c0_i32 = arith.constant 0 : i32
    %c0_i32_1 = arith.constant 0 : i32
    %c0_i32_2 = arith.constant 0 : i32
    return %5, %c0_i32, %c0_i32_1 : i32, i32, i32
  }
  func.func @transform_2(%arg0: i32, %arg1: i32, %arg2: memref<1xi32, #tpu.memory_space<smem>>, %arg3: memref<16xi32, #tpu.memory_space<smem>>) -> (i32, i32, i32) {
    %c8_i32 = arith.constant 8 : i32
    %0 = arith.muli %arg0, %c8_i32 : i32
    %c8_i32_0 = arith.constant 8 : i32
    %1 = arith.muli %arg1, %c8_i32_0 : i32
    %2 = arith.addi %0, %1 : i32
    %c2_i32 = arith.constant 2 : i32
    %3 = arith.addi %2, %c2_i32 : i32
    %4 = arith.index_cast %3 : i32 to index
    %5 = memref.load %arg3[%4] : memref<16xi32, #tpu.memory_space<smem>>
    %c0_i32 = arith.constant 0 : i32
    %c0_i32_1 = arith.constant 0 : i32
    %c0_i32_2 = arith.constant 0 : i32
    return %5, %c0_i32, %c0_i32_1 : i32, i32, i32
  }
  func.func @transform_3(%arg0: i32, %arg1: i32, %arg2: memref<1xi32, #tpu.memory_space<smem>>, %arg3: memref<16xi32, #tpu.memory_space<smem>>) -> (i32, i32, i32) {
    %c8_i32 = arith.constant 8 : i32
    %0 = arith.muli %arg0, %c8_i32 : i32
    %c8_i32_0 = arith.constant 8 : i32
    %1 = arith.muli %arg1, %c8_i32_0 : i32
    %2 = arith.addi %0, %1 : i32
    %c3_i32 = arith.constant 3 : i32
    %3 = arith.addi %2, %c3_i32 : i32
    %4 = arith.index_cast %3 : i32 to index
    %5 = memref.load %arg3[%4] : memref<16xi32, #tpu.memory_space<smem>>
    %c0_i32 = arith.constant 0 : i32
    %c0_i32_1 = arith.constant 0 : i32
    %c0_i32_2 = arith.constant 0 : i32
    return %5, %c0_i32, %c0_i32_1 : i32, i32, i32
  }
  func.func @transform_4(%arg0: i32, %arg1: i32, %arg2: memref<1xi32, #tpu.memory_space<smem>>, %arg3: memref<16xi32, #tpu.memory_space<smem>>) -> (i32, i32, i32) {
    %c8_i32 = arith.constant 8 : i32
    %0 = arith.muli %arg0, %c8_i32 : i32
    %c8_i32_0 = arith.constant 8 : i32
    %1 = arith.muli %arg1, %c8_i32_0 : i32
    %2 = arith.addi %0, %1 : i32
    %c4_i32 = arith.constant 4 : i32
    %3 = arith.addi %2, %c4_i32 : i32
    %4 = arith.index_cast %3 : i32 to index
    %5 = memref.load %arg3[%4] : memref<16xi32, #tpu.memory_space<smem>>
    %c0_i32 = arith.constant 0 : i32
    %c0_i32_1 = arith.constant 0 : i32
    %c0_i32_2 = arith.constant 0 : i32
    return %5, %c0_i32, %c0_i32_1 : i32, i32, i32
  }
  func.func @transform_5(%arg0: i32, %arg1: i32, %arg2: memref<1xi32, #tpu.memory_space<smem>>, %arg3: memref<16xi32, #tpu.memory_space<smem>>) -> (i32, i32, i32) {
    %c8_i32 = arith.constant 8 : i32
    %0 = arith.muli %arg0, %c8_i32 : i32
    %c8_i32_0 = arith.constant 8 : i32
    %1 = arith.muli %arg1, %c8_i32_0 : i32
    %2 = arith.addi %0, %1 : i32
    %c5_i32 = arith.constant 5 : i32
    %3 = arith.addi %2, %c5_i32 : i32
    %4 = arith.index_cast %3 : i32 to index
    %5 = memref.load %arg3[%4] : memref<16xi32, #tpu.memory_space<smem>>
    %c0_i32 = arith.constant 0 : i32
    %c0_i32_1 = arith.constant 0 : i32
    %c0_i32_2 = arith.constant 0 : i32
    return %5, %c0_i32, %c0_i32_1 : i32, i32, i32
  }
  func.func @transform_6(%arg0: i32, %arg1: i32, %arg2: memref<1xi32, #tpu.memory_space<smem>>, %arg3: memref<16xi32, #tpu.memory_space<smem>>) -> (i32, i32, i32) {
    %c8_i32 = arith.constant 8 : i32
    %0 = arith.muli %arg0, %c8_i32 : i32
    %c8_i32_0 = arith.constant 8 : i32
    %1 = arith.muli %arg1, %c8_i32_0 : i32
    %2 = arith.addi %0, %1 : i32
    %c6_i32 = arith.constant 6 : i32
    %3 = arith.addi %2, %c6_i32 : i32
    %4 = arith.index_cast %3 : i32 to index
    %5 = memref.load %arg3[%4] : memref<16xi32, #tpu.memory_space<smem>>
    %c0_i32 = arith.constant 0 : i32
    %c0_i32_1 = arith.constant 0 : i32
    %c0_i32_2 = arith.constant 0 : i32
    return %5, %c0_i32, %c0_i32_1 : i32, i32, i32
  }
  func.func @transform_7(%arg0: i32, %arg1: i32, %arg2: memref<1xi32, #tpu.memory_space<smem>>, %arg3: memref<16xi32, #tpu.memory_space<smem>>) -> (i32, i32, i32) {
    %c8_i32 = arith.constant 8 : i32
    %0 = arith.muli %arg0, %c8_i32 : i32
    %c8_i32_0 = arith.constant 8 : i32
    %1 = arith.muli %arg1, %c8_i32_0 : i32
    %2 = arith.addi %0, %1 : i32
    %c7_i32 = arith.constant 7 : i32
    %3 = arith.addi %2, %c7_i32 : i32
    %4 = arith.index_cast %3 : i32 to index
    %5 = memref.load %arg3[%4] : memref<16xi32, #tpu.memory_space<smem>>
    %c0_i32 = arith.constant 0 : i32
    %c0_i32_1 = arith.constant 0 : i32
    %c0_i32_2 = arith.constant 0 : i32
    return %5, %c0_i32, %c0_i32_1 : i32, i32, i32
  }
  func.func @transform_8(%arg0: i32, %arg1: i32, %arg2: memref<1xi32, #tpu.memory_space<smem>>, %arg3: memref<16xi32, #tpu.memory_space<smem>>) -> (i32, i32) {
    %c0_i32 = arith.constant 0 : i32
    %c0_i32_0 = arith.constant 0 : i32
    return %arg0, %c0_i32 : i32, i32
  }
}

</mosaic_0001>

<bundles_post_ra>
// kernel: tpu_custom_call.1
= control target key start
LH: loop header
LB: loop body
LE: loop exit
PB: predicated region body
PF: predicated region fallthrough
CT: control target
= control target key end

     0   :  { %s2790_s0 = inlined_call_operand.<no memory space> [shape: s32[1], index: 0, kind: input, shape index: {}]   ;;  %s2791_s1 = inlined_call_operand.vmem [shape: s32[16], index: 1, kind: input, shape index: {}]   ;;  %s2792_s2 = inlined_call_operand.hbm [shape: f32[32,1,128], index: 2, kind: input, shape index: {}]   ;;  %s2793_s3 = inlined_call_operand.hbm [shape: f32[32,1,128], index: 3, kind: input, shape index: {}]   ;;  %s2794_s4 = inlined_call_operand.hbm [shape: f32[32,1,128], index: 4, kind: input, shape index: {}]   ;;  %s2795_s5 = inlined_call_operand.hbm [shape: f32[32,1,128], index: 5, kind: input, shape index: {}]   ;;  %s2796_s6 = inlined_call_operand.hbm [shape: f32[32,1,128], index: 6, kind: input, shape index: {}]   ;;  %s2797_s7 = inlined_call_operand.hbm [shape: f32[32,1,128], index: 7, kind: input, shape index: {}]   ;;  %s2798_s8 = inlined_call_operand.hbm [shape: f32[32,1,128], index: 8, kind: input, shape index: {}]   ;;  %s2799_s9 = inlined_call_operand.vmem [shape: f32[32,1,128], index: 9, kind: input, shape index: {}]   ;;  %s2800_s10 = inlined_call_operand.hbm [shape: f32[16,128], index: 10, kind: output, shape index: {}]  }
   0x1   :  { %2856 = sst [smem:[#allocation72_spill]] %s2792_s2  ;;  %s16_s14 = sshll.u32 %s2791_s1, 4  ;;  %s17_s14 = int_to_ptr.vmem [resolvable:$true] %s16_s14 }
   0x2   :  { %2857 = sst [smem:[#allocation73_spill]] %s2793_s3  ;;  %s1320_s15 = scalar_lea.vmem %s17_s14, 16 }
   0x3   :  { %2858 = sst [smem:[#allocation74_spill]] %s2794_s4  ;;  %p1321_p0 = scmp.ne.s32.totalorder %s17_s14, %s1320_s15 }
   0x4   :  { %2859 = sst [smem:[#allocation75_spill]] %s2795_s5  ;;  %p1325_p1 = scmp.lt.s32.totalorder %s17_s14, %s17_s14 }
   0x5   :  { %2860 = sst [smem:[#allocation76_spill]] %s2796_s6  ;;  %p1326_p2 = scmp.lt.s32.totalorder %s1320_s15, %s1320_s15 }
   0x6   :  { %2861 = sst [smem:[#allocation77_spill]] %s2797_s7 }
   0x7   :  { %2862 = sst [smem:[#allocation78_spill]] %s2798_s8  ;;  %p1327_p3 = por %p1326_p2, %p1325_p1 }
   0x8   :  { %2863 = sst [smem:[#allocation79_spill]] %s2799_s9 }
   0x9   :  { %2864 = sst [smem:[#allocation80_spill]] %s2800_s10  ;;  %p1328_p4 = pnand %p1327_p3, %p1321_p0 }
   0xb   :  { %1331 = shalt.err (!%p1328_p4)  }
   0xc   :  { %s1820_s16 = smov [#allocation4]  }
   0xd   :  { %19 = dma.vmem_to_smem %s17_s14, 16, %s1820_s16, [#allocation2] }
   0xe   :  { %1678 = dma.done.wait [#allocation2], 16 }
   0xf   :  { %1679 = vsyncadd [#allocation2], 4294967280 }
  0x10   :  { %21 = sfence }
  0x11   :  { %22 = vsyncpa [#allocation6], 0 }
  0x12   :  { %24 = vsyncpa [#allocation6 + $0x1], 0 }
  0x13   :  { %25 = vsyncpa [#allocation9], 0 }
  0x14   :  { %27 = vsyncpa [#allocation9 + $0x1], 0 }
  0x15   :  { %28 = vsyncpa [#allocation12], 0 }
  0x16   :  { %30 = vsyncpa [#allocation12 + $0x1], 0 }
  0x17   :  { %31 = vsyncpa [#allocation15], 0 }
  0x18   :  { %33 = vsyncpa [#allocation15 + $0x1], 0 }
  0x19   :  { %34 = vsyncpa [#allocation7], 0 }
  0x1a   :  { %36 = vsyncpa [#allocation7 + $0x1], 0  ;;  %s1887_s1 = smov 0   ;;  %s1889_s17 = smov 0  }
  0x1b   :  { %s1891_s18 = smov 0   ;;  %s1893_s19 = smov 0  }
  0x1c   :  { %s1895_s20 = smov 0   ;;  %s1897_s21 = smov 0  }
  0x1d   :  { %s1899_s22 = smov 0   ;;  %s1901_s23 = smov 0  }
  0x1e   :  { %s1903_s24 = smov 0   ;;  %s1905_s25 = smov 0  }
  0x1f   :  { %s1907_s0 = smov 0   ;;  %s1909_s26 = smov 0  }
  0x20   :  { %s1911_s27 = smov 0   ;;  %s1913_s28 = smov 0  }
  0x21   :  { %s1915_s29 = smov 0   ;;  %s1917_s30 = smov 0  }
  0x22   :  { %s1919_s11 = smov 0   ;;  %s1921_s12 = smov 0  }
  0x23   :  { %s1923_s13 = smov 0   ;;  %s1925_s14 = smov 0  }
  0x24   :  { %s1927_s15 = smov 0   ;;  %s1929_s16 = smov 0  }
  0x25   :  { %s1931_s9 = smov 0   ;;  %s1933_s10 = smov 0  }
  0x26   :  { %s1935_s8 = smov 0   ;;  %s1937_s6 = smov 0  }
  0x27   :  { %s1939_s4 = smov 0  }
  0x28 LB: > { %2865 = sst [smem:[#allocation41_spill]] %s1714_s1  ;;  %p2827_p6 = scmp.eq.s32.totalorder %s1818_s4, 0  ;;  %s1818_s4 = sphi %s1939_s4, %s42_s4   ;;  %s1814_s6 = sphi %s1937_s6, %s3042_s6   ;;  %s1810_s8 = sphi %s1935_s8, %s3041_s8   ;;  %s1806_s10 = sphi %s1933_s10, %s3031_s10   ;;  %s1802_s9 = sphi %s1931_s9, %s3040_s9   ;;  %s1798_s16 = sphi %s1929_s16, %s3039_s16   ;;  %s1794_s15 = sphi %s1927_s15, %s3027_s15   ;;  %s1790_s14 = sphi %s1925_s14, %s3038_s14   ;;  %s1786_s13 = sphi %s1923_s13, %s3037_s13   ;;  %s1782_s12 = sphi %s1921_s12, %s3025_s12   ;;  %s1778_s11 = sphi %s1919_s11, %s3024_s11   ;;  %s1774_s30 = sphi %s1917_s30, %s3022_s30   ;;  %s1770_s29 = sphi %s1915_s29, %s3021_s29   ;;  %s1766_s28 = sphi %s1913_s28, %s3036_s28   ;;  %s1762_s27 = sphi %s1911_s27, %s3035_s27   ;;  %s1758_s26 = sphi %s1909_s26, %s3034_s26   ;;  %s1754_s0 = sphi %s1907_s0, %s3018_s0   ;;  %s1750_s25 = sphi %s1905_s25, %s3017_s25   ;;  %s1746_s24 = sphi %s1903_s24, %s3016_s24   ;;  %s1742_s23 = sphi %s1901_s23, %s3030_s23   ;;  %s1738_s22 = sphi %s1899_s22, %s3014_s22   ;;  %s1734_s21 = sphi %s1897_s21, %s3028_s21   ;;  %s1730_s20 = sphi %s1895_s20, %s3013_s20   ;;  %s1726_s19 = sphi %s1893_s19, %s3012_s19   ;;  %s1722_s18 = sphi %s1891_s18, %s3011_s18   ;;  %s1718_s17 = sphi %s1889_s17, %s3010_s17   ;;  %s1714_s1 = sphi %s1887_s1, %s3023_s1  }
  0x29   : > { %2866 = sst [smem:[#allocation42_spill]] %s1718_s17  ;;  %s105_s2 = sadd.s32 1, %s1794_s15 }
  0x2a   : > { %2867 = sst [smem:[#allocation43_spill]] %s1722_s18  ;;  %p112_p8 = scmp.ne.s32.totalorder %s1794_s15, %s1790_s14 }
  0x2b   : > { %2868 = sst [smem:[#allocation44_spill]] %s1726_s19  ;;  %s2021_s19 = sadd.s32 4294967295, %s1818_s4  }
  0x2c   : > { %2869 = sst [smem:[#allocation45_spill]] %s1730_s20  ;;  %s54_s20 = sadd.s32 1, %s1814_s6 }
  0x2d   : > { %2870 = sst [smem:[#allocation46_spill]] %s1734_s21  ;;  %s984_s21 = sadd.s32 4294967294, %s1818_s4  }
  0x2e   : > { %2871 = sst [smem:[#allocation47_spill]] %s1742_s23  ;;  %p56_p5 = scmp.ge.s32.totalorder %s54_s20, 2 }
  0x2f   : > { %2872 = sst [smem:[#allocation48_spill]] %s1746_s24  ;;  %p2826_p7 = scmp.eq.s32.totalorder %s2021_s19, 0 }
  0x30   : > { %2873 = sst [smem:[#allocation49_spill]] %s1750_s25  ;;  %s2026_s25 = sshll.u32 %s1814_s6, 3 }
  0x31   : > { %2874 = sst [smem:[#allocation50_spill]] %s1754_s0  ;;  %s3044_s20 = smov (%p56_p5, %s54_s20), 0 }
  0x32   : > { %2875 = sst [smem:[#allocation51_spill]] %s1758_s26  ;;  %s2886_s26 = smov %s3044_s20 }
  0x33   : > { %2876 = sst [smem:[#allocation52_spill]] %s1770_s29  ;;  %p118_p9 = scmp.ne.s32.totalorder %s1790_s14, %s1786_s13 }
  0x34   : > { %2877 = sst [smem:[#allocation53_spill]] %s1774_s30  ;;  %s2035_s30 = sshll.u32 %s2886_s26, 3 }
  0x35   : > { %2878 = sst [smem:[#allocation54_spill]] %s1778_s11  ;;  %p2043_p10 = por %p112_p8, %p2827_p6 }
  0x36   : > { %2879 = sst [smem:[#allocation55_spill]] %s1782_s12  ;;  %s100_s12 = sadd.s32 1, %s2035_s30 }
  0x37   : > { %2880 = sst [smem:[#allocation56_spill]] %s1794_s15  ;;  %p2049_p11 = por %p118_p9, %p2826_p7 }
  0x38   : > { %2881 = sst [smem:[#allocation57_spill]] %s1798_s16  ;;  %s344_s7 = ssub.s32 %s1814_s6, %s2886_s26 }
  0x39   : > { %2882 = sst [smem:[#allocation58_spill]] %s1806_s10  ;;  %p345_p12 = scmp.eq.s32.totalorder %s344_s7, 0 }
  0x3a   : > { %2883 = sst [smem:[#allocation59_spill]] %s1810_s8  ;;  %s95_s8 = sadd.s32 1, %s2026_s25 }
  0x3b   : > { %2884 = sst [smem:[#allocation60_spill]] %s1814_s6  ;;  %s347_s10 = sadd.s32 1, %s1722_s18 }
  0x3c   : > { %2885 = sst [smem:[#allocation61_spill]] %s3044_s20  ;;  %p357_p13 = scmp.ne.s32.totalorder %s1722_s18, %s1718_s17 }
  0x3d   : > { %s96_s0 = sld [smem:[#allocation4 + %s95_s8]]  ;;  %p358_p0 = scmp.eq.s32.totalorder %s2021_s19, 1 }
  0x3e   : > { %s101_s11 = sld [smem:[#allocation4 + %s100_s12]]  ;;  %p363_p2 = scmp.ne.s32.totalorder %s1718_s17, %s1714_s1 }
  0x3f   : > { %s2888_s20 = scalar_select %p2049_p11, 1, 0 }
  0x40   : > { %s2060_s12 = scalar_select %p345_p12, %s1722_s18, %s347_s10  }
  0x41   : > { %2889 = sst [smem:[#allocation62_spill]] %s2888_s20  ;;  %p2062_p1 = por %p358_p0, %p357_p13 }
  0x42   : > { %2890 = sst [smem:[#allocation63_spill]] %s2060_s12  ;;  %p364_p3 = scmp.eq.s32.totalorder %s984_s21, 1 }
  0x43   : > { %s2891_s13 = scalar_select %p2062_p1, 1, 0 }
  0x44   : > { %s102_s20 = ssub.s32 %s96_s0, %s101_s11  ;;  %p2069_p8 = por %p364_p3, %p363_p2 }
  0x45   : > { %2892 = sst [smem:[#allocation64_spill]] %s2891_s13  ;;  %p103_p4 = scmp.eq.s32.totalorder %s102_s20, 0 }
  0x46   : > { %s2893_s7 = scalar_select %p2069_p8, 1, 0 }
  0x47   : > { %p2825_p9 = scmp.lt.s32.totalorder %s1818_s4, 2  ;;  %s2078_s26 = sand.u32 1, %s1818_s4  }
  0x48   : > { %2894 = sst [smem:[#allocation65_spill]] %s2893_s7  ;;  %s407_s6 = sand.u32 1, %s1794_s15  }
  0x49   : > { %s2075_s10 = scalar_select %p103_p4, %s1794_s15, %s105_s2  }
  0x4a   : > { %s1034_s12 = scalar_select %p2043_p10, [#allocation4], [#allocation19] }
  0x4b   : > { %2895 = sst [smem:[#allocation66_spill]] %s2075_s10  ;;  %s3046_s8 = smov (!%p2043_p10, %s95_s8), 0 }
  0x4c   : > { %s3048_s12 = smov (!%p2825_p9, %s1034_s12), [#allocation26]  ;;  %s3050_s8 = smov (!%p2825_p9, %s3046_s8), 0 }
  0x4d   : > { %s408_s21 = scalar_lea.vmem [#allocation8], %s407_s6  ;;  %p2093_p12 = pnand %p2825_p9, %p2043_p10 }
  0x4e   : > { %s420_s0 = sshll.u32 %s408_s21, 4  ;;  %s413_s11 = sld [smem:[%s3048_s12 + %s3050_s8]]  ;;  %s2097_s0 = int_to_ptr.vmem [resolvable:$true] %s420_s0 }
  0x4f   : > { %p1017_p13 = scmp.ge.s32.totalorder %s1818_s4, 1  ;;  %p551_p0 = scmp.lt.s32.totalorder %s1818_s4, 3 }
  0x50   : > { %s2828_s6 = sadd.s32 3, %s2026_s25  ;;  %s2898_s3 = sld [smem:[#allocation73_spill]] }
  0x51   : > { %p2101_p2 = pnand %p1017_p13, %p551_p0  ;;  %s2113_s8 = sld [smem:[#allocation4 + %s2828_s6]] }
  0x52   : > { %s2831_s12 = scalar_lea.sflag [#allocation9], %s2078_s26  ;;  %p1334_p3 = pneg %p2093_p12 }
  0x54   : > { %s1006_s10 = sshll.u32 %s413_s11, 4 }
  0x56   : > { %s2109_s15 = scalar_lea.hbm %s2898_s3, %s1006_s10  ;;  %s1337_s10 = scalar_lea.hbm %s2898_s3, 512 }
  0x57   : > { %s1332_s18 = scalar_lea.hbm %s2109_s15, 16  ;;  %p1338_p0 = scmp.lt.u32.totalorder %s2109_s15, %s2898_s3 }
  0x58   : > { %p1333_p10 = scmp.ne.s32.totalorder %s2109_s15, %s1332_s18  ;;  %p1339_p5 = scmp.lt.u32.totalorder %s1337_s10, %s1332_s18 }
  0x59   : > { %p1341_p7 = scmp.lt.u32.totalorder %s1332_s18, %s2109_s15 }
  0x5a   : > { %p1335_p4 = pnand %p1334_p3, %p1333_p10  ;;  %p1340_p9 = por %p1339_p5, %p1338_p0 }
  0x5c   : > { %p1336_p13 = pneg %p1335_p4  ;;  %p1342_p6 = por %p1341_p7, %p1340_p9 }
  0x5e   : > { %p1343_p8 = pnand %p1342_p6, %p1336_p13 }
  0x60   : > { %1346 = shalt.err (!%p1343_p8)
}
  0x61   : > { %s1347_s6 = scalar_lea.vmem %s2097_s0, 16  ;;  %s1821_s11 = smov [#allocation8]  }
  0x62   : > { %p1348_p10 = scmp.ne.s32.totalorder %s2097_s0, %s1347_s6  ;;  %s1352_s21 = sshll.u32 %s1821_s11, 4  ;;  %s1353_s21 = int_to_ptr.vmem [resolvable:$false] %s1352_s21 }
  0x63   : > { %s1354_s7 = scalar_lea.vmem %s1353_s21, 32  ;;  %p1355_p11 = scmp.lt.s32.totalorder %s2097_s0, %s1353_s21 }
  0x64   : > { %p1350_p4 = pnand %p1348_p10, %p1334_p3  ;;  %p1356_p5 = scmp.lt.s32.totalorder %s1354_s7, %s1347_s6 }
  0x66   : > { %p1351_p1 = pneg %p1350_p4  ;;  %p1357_p0 = por %p1356_p5, %p1355_p11 }
  0x68   : > { %p1358_p7 = pnand %p1357_p0, %p1351_p1 }
  0x6a   : > { %1361 = shalt.err (!%p1358_p7)
}
  0x6b   : > { %1071 = dma.hbm_to_vmem [thread:$0]  (!%p2093_p12), %s2109_s15, 16, %s2097_s0, %s2831_s12  }
  0x6c   : > { %s172_s18 = sadd.s32 3, %s2035_s30  ;;  %p184_p6 = scmp.ne.s32.totalorder %s1770_s29, %s1766_s28 }
  0x6d   : > { %s173_s2 = sld [smem:[#allocation4 + %s172_s18]]  ;;  %s177_s6 = sadd.s32 1, %s1770_s29 }
  0x6e   : > { %p190_p11 = scmp.ne.s32.totalorder %s1766_s28, %s1762_s27  ;;  %p2899_p1 = scmp.eq.s32.totalorder %s1818_s4, 0 }
  0x6f   : > { %s451_s10 = sand.u32 1, %s1770_s29   ;;  %p2900_p9 = scmp.eq.s32.totalorder %s2021_s19, 0 }
  0x70   : > { %p186_p8 = por %p184_p6, %p2899_p1  ;;  %s2902_s0 = sadd.s32 3, %s2026_s25 }
  0x71   : > { %p2154_p3 = por %p190_p11, %p2900_p9  ;;  %s452_s27 = scalar_lea.vmem [#allocation11], %s451_s10 }
  0x72   : > { %s1040_s15 = scalar_select %p186_p8, [#allocation4], [#allocation21] }
  0x73   : > { %s2901_s16 = scalar_select %p2154_p3, 1, 0 }
  0x74   : > { %s3052_s0 = smov (!%p186_p8, %s2902_s0), 0  ;;  %s174_s11 = ssub.s32 %s2113_s8, %s173_s2 }
  0x75   : > { %p175_p12 = scmp.eq.s32.totalorder %s174_s11, 0  ;;  %s464_s21 = sshll.u32 %s452_s27, 4  ;;  %s2180_s21 = int_to_ptr.vmem [resolvable:$true] %s464_s21 }
  0x76   : > { %p2903_p13 = scmp.lt.s32.totalorder %s1818_s4, 2  ;;  %s2832_s2 = sadd.s32 5, %s2026_s25 }
  0x77   : > { %s2164_s7 = scalar_select %p175_p12, %s1770_s29, %s177_s6  }
  0x78   : > { %s3054_s15 = smov (!%p2903_p13, %s1040_s15), [#allocation28]  ;;  %p2905_p10 = pmov %p2903_p13 }
  0x79   : > { %2904 = sst [smem:[#allocation67_spill]] %s2164_s7  ;;  %s244_s10 = sadd.s32 5, %s2035_s30 }
  0x7a   : > { %s3056_s0 = smov (!%p2905_p10, %s3052_s0), 0  ;;  %p2906_p4 = pmov %p2905_p10 }
  0x7b   : > { %s457_s8 = sld [smem:[%s3054_s15 + %s3056_s0]]  ;;  %s2834_s15 = scalar_lea.sflag [#allocation12], %s2078_s26 }
  0x7c   : > { %p2170_p5 = pnand %p2906_p4, %p186_p8  ;;  %s2177_s11 = sld [smem:[#allocation4 + %s2832_s2]] }
  0x7d   : > { %s2182_s27 = sld [smem:[#allocation4 + %s244_s10]] }
  0x7e   : > { %s2908_s5 = sld [smem:[#allocation75_spill]]  ;;  %p1364_p11 = pneg %p2170_p5 }
  0x81   : > { %s1010_s6 = sshll.u32 %s457_s8, 4 }
  0x84   : > { %s2189_s7 = scalar_lea.hbm %s2908_s5, %s1010_s6  ;;  %s1367_s3 = scalar_lea.hbm %s2908_s5, 512 }
  0x85   : > { %s1362_s0 = scalar_lea.hbm %s2189_s7, 16  ;;  %p1368_p9 = scmp.lt.u32.totalorder %s2189_s7, %s2908_s5 }
  0x86   : > { %p1363_p6 = scmp.ne.s32.totalorder %s2189_s7, %s1362_s0  ;;  %p1369_p12 = scmp.lt.u32.totalorder %s1367_s3, %s1362_s0 }
  0x87   : > { %p1371_p10 = scmp.lt.u32.totalorder %s1362_s0, %s2189_s7 }
  0x88   : > { %p1365_p1 = pnand %p1364_p11, %p1363_p6  ;;  %p1370_p13 = por %p1369_p12, %p1368_p9 }
  0x8a   : > { %p1366_p8 = pneg %p1365_p1  ;;  %p1372_p4 = por %p1371_p10, %p1370_p13 }
  0x8c   : > { %p1373_p7 = pnand %p1372_p4, %p1366_p8 }
  0x8e   : > { %1376 = shalt.err (!%p1373_p7)
}
  0x8f   : > { %s1377_s2 = scalar_lea.vmem %s2180_s21, 16  ;;  %s1822_s8 = smov [#allocation11]  }
  0x90   : > { %p1378_p6 = scmp.ne.s32.totalorder %s2180_s21, %s1377_s2  ;;  %s1382_s10 = sshll.u32 %s1822_s8, 4  ;;  %s1383_s10 = int_to_ptr.vmem [resolvable:$false] %s1382_s10 }
  0x91   : > { %s1384_s12 = scalar_lea.vmem %s1383_s10, 32  ;;  %p1385_p3 = scmp.lt.s32.totalorder %s2180_s21, %s1383_s10 }
  0x92   : > { %p1380_p1 = pnand %p1378_p6, %p1364_p11  ;;  %p1386_p9 = scmp.lt.s32.totalorder %s1384_s12, %s1377_s2 }
  0x94   : > { %p1381_p0 = pneg %p1380_p1  ;;  %p1387_p12 = por %p1386_p9, %p1385_p3 }
  0x96   : > { %p1388_p13 = pnand %p1387_p12, %p1381_p0 }
  0x98   : > { %1391 = shalt.err (!%p1388_p13)
}
  0x99   : > { %1081 = dma.hbm_to_vmem [thread:$0]  (!%p2170_p5), %s2189_s7, 16, %s2180_s21, %s2834_s15  }
  0x9a   : > { %p2909_p3 = scmp.eq.s32.totalorder %s1818_s4, 0  ;;  %p2910_p0 = scmp.ne.s32.totalorder %s1746_s24, %s1742_s23 }
  0x9b   : > { %p2912_p11 = scmp.eq.s32.totalorder %s2021_s19, 0  ;;  %p2913_p8 = scmp.ne.s32.totalorder %s1742_s23, %s1738_s22 }
  0x9c   : > { %p2226_p7 = por %p2910_p0, %p2909_p3  ;;  %s249_s0 = sadd.s32 1, %s1746_s24 }
  0x9d   : > { %p2235_p10 = por %p2913_p8, %p2912_p11  ;;  %s495_s3 = sand.u32 1, %s1746_s24  }
  0x9e   : > { %s246_s21 = ssub.s32 %s2177_s11, %s2182_s27  ;;  %s2916_s7 = sld [smem:[#allocation58_spill]] }
  0x9f   : > { %s2914_s2 = scalar_select %p2235_p10, 1, 0 }
  0xa0   : > { %p247_p5 = scmp.eq.s32.totalorder %s246_s21, 0  ;;  %s496_s6 = scalar_lea.vmem [#allocation14], %s495_s3 }
  0xa1   : > { %2915 = sst [smem:[#allocation68_spill]] %s2914_s2  ;;  %s508_s8 = sshll.u32 %s496_s6, 4  ;;  %s2264_s8 = int_to_ptr.vmem [resolvable:$true] %s508_s8 }
  0xa2   : > { %s1046_s22 = scalar_select %p2226_p7, [#allocation4], [#allocation23] }
  0xa3   : > { %s2246_s10 = scalar_select %p247_p5, %s1746_s24, %s249_s0  }
  0xa4   : > { %s2918_s12 = sadd.s32 5, %s2026_s25  ;;  %p2919_p4 = scmp.lt.s32.totalorder %s1818_s4, 2 }
  0xa5   : > { %2917 = sst [smem:[#allocation69_spill]] %s2246_s10  ;;  %s3058_s12 = smov (!%p2226_p7, %s2918_s12), 0 }
  0xa6   : > { %s3060_s22 = smov (!%p2919_p4, %s1046_s22), [#allocation30]  ;;  %p2920_p6 = pmov %p2919_p4 }
  0xa7   : > { %p2921_p1 = pmov %p2919_p4  ;;  %s2267_s0 = sld [smem:[#allocation4 + %s2026_s25]] }
  0xa8   : > { %s3062_s12 = smov (!%p2920_p6, %s3058_s12), 0  ;;  %s2270_s3 = sld [smem:[#allocation4 + %s2035_s30]] }
  0xa9   : > { %p2260_p9 = pnand %p2921_p1, %p2226_p7  ;;  %s501_s27 = sld [smem:[%s3060_s22 + %s3062_s12]] }
  0xaa   : > { %s2923_s5 = sld [smem:[#allocation77_spill]]  ;;  %s2837_s18 = scalar_lea.sflag [#allocation15], %s2078_s26 }
  0xab   : > { %p1394_p3 = pneg %p2260_p9 }
  0xaf   : > { %s1014_s21 = sshll.u32 %s501_s27, 4 }
  0xb0   : > { %s2275_s29 = scalar_lea.hbm %s2923_s5, %s1014_s21  ;;  %s1397_s15 = scalar_lea.hbm %s2923_s5, 512 }
  0xb1   : > { %s1392_s10 = scalar_lea.hbm %s2275_s29, 16  ;;  %p1398_p11 = scmp.lt.u32.totalorder %s2275_s29, %s2923_s5 }
  0xb2   : > { %p1393_p13 = scmp.ne.s32.totalorder %s2275_s29, %s1392_s10  ;;  %p1399_p8 = scmp.lt.u32.totalorder %s1397_s15, %s1392_s10 }
  0xb3   : > { %p1401_p4 = scmp.lt.u32.totalorder %s1392_s10, %s2275_s29 }
  0xb4   : > { %p1395_p0 = pnand %p1394_p3, %p1393_p13  ;;  %p1400_p5 = por %p1399_p8, %p1398_p11 }
  0xb6   : > { %p1396_p7 = pneg %p1395_p0  ;;  %p1402_p6 = por %p1401_p4, %p1400_p5 }
  0xb8   : > { %p1403_p1 = pnand %p1402_p6, %p1396_p7 }
  0xba   : > { %1406 = shalt.err (!%p1403_p1)
}
  0xbb   : > { %s1407_s6 = scalar_lea.vmem %s2264_s8, 16  ;;  %s1823_s22 = smov [#allocation14]  }
  0xbc   : > { %p1408_p13 = scmp.ne.s32.totalorder %s2264_s8, %s1407_s6  ;;  %s1412_s12 = sshll.u32 %s1823_s22, 4  ;;  %s1413_s12 = int_to_ptr.vmem [resolvable:$false] %s1412_s12 }
  0xbd   : > { %s1414_s27 = scalar_lea.vmem %s1413_s12, 32  ;;  %p1415_p10 = scmp.lt.s32.totalorder %s2264_s8, %s1413_s12 }
  0xbe   : > { %p1410_p0 = pnand %p1408_p13, %p1394_p3  ;;  %p1416_p11 = scmp.lt.s32.totalorder %s1414_s27, %s1407_s6 }
  0xc0   : > { %p1411_p12 = pneg %p1410_p0  ;;  %p1417_p8 = por %p1416_p11, %p1415_p10 }
  0xc2   : > { %p1418_p5 = pnand %p1417_p8, %p1411_p12 }
  0xc4   : > { %1421 = shalt.err (!%p1418_p5)
}
  0xc5   : > { %s2924_s10 = sld [smem:[#allocation57_spill]]  ;;  %s69_s11 = sadd.s32 1, %s2916_s7 }
  0xc6   : > { %1091 = dma.hbm_to_vmem [thread:$0]  (!%p2260_p9), %s2275_s29, 16, %s2264_s8, %s2837_s18  }
  0xc7   : > { %p2925_p12 = scmp.ne.s32.totalorder %s2916_s7, %s1802_s9  ;;  %p2926_p3 = scmp.eq.s32.totalorder %s1818_s4, 0 }
  0xc8   : > { %s384_s15 = sand.u32 1, %s2916_s7   ;;  %s66_s21 = ssub.s32 %s2267_s0, %s2270_s3 }
  0xc9   : > { %p78_p7 = por %p2926_p3, %p2925_p12  ;;  %p2927_p4 = scmp.eq.s32.totalorder %s2021_s19, 0 }
  0xca   : > { %p67_p1 = scmp.eq.s32.totalorder %s66_s21, 0  ;;  %p2929_p13 = scmp.lt.s32.totalorder %s1818_s4, 2 }
  0xcb   : > { %p82_p10 = scmp.ne.s32.totalorder %s1802_s9, %s2924_s10  ;;  %s2930_s22 = sld [smem:[#allocation54_spill]] }
  0xcc   : > { %s2931_s12 = sld [smem:[#allocation55_spill]]  ;;  %p2326_p9 = pnand %p2929_p13, %p78_p7 }
  0xcd   : > { %p2320_p6 = por %p2927_p4, %p82_p10  ;;  %s3064_s7 = smov (!%p67_p1, %s2916_s7), %s69_s11 }
  0xce   : > { %2933 = sst [smem:[#allocation70_spill]] %s3064_s7  ;;  %s2934_s8 = sld [smem:[#allocation53_spill]] }
  0xcf   : > { %s2928_s6 = scalar_select %p2320_p6, 1, 0 }
  0xd0   : > { %s1031_s27 = scalar_select %p78_p7, [#allocation4], [#allocation18] }
  0xd1   : > { %s1032_s10 = scalar_select %p78_p7, %s2026_s25, 0 }
  0xd2   : > { %p2935_p0 = pmov %p2929_p13  ;;  %s387_s3 = scalar_lea.vmem [#allocation5], %s384_s15 }
  0xd3   : > { %s398_s21 = sshll.u32 %s387_s3, 4  ;;  %s131_s18 = sadd.s32 2, %s2026_s25  ;;  %s2344_s21 = int_to_ptr.vmem [resolvable:$true] %s398_s21 }
  0xd4   : > { %s3066_s27 = smov (!%p2935_p0, %s1031_s27), [#allocation25]  ;;  %p2936_p11 = pmov %p2935_p0 }
  0xd5   : > { %s2341_s5 = sld [smem:[#allocation4 + %s131_s18]]  ;;  %s136_s24 = sadd.s32 2, %s2035_s30 }
  0xd6   : > { %s3068_s10 = smov (!%p2936_p11, %s1032_s10), 0  ;;  %s2346_s11 = sld [smem:[#allocation4 + %s136_s24]] }
  0xd7   : > { %s391_s0 = sld [smem:[%s3066_s27 + %s3068_s10]]  ;;  %s385_s27 = scalar_lea.sflag [#allocation6], %s384_s15 }
  0xd8   : > { %s2937_s17 = sld [smem:[#allocation72_spill]]  ;;  %p1424_p12 = pneg %p2326_p9 }
  0xdd   : > { %s1004_s7 = sshll.u32 %s391_s0, 4 }
  0xde   : > { %s2938_s2 = smov %s2937_s17  ;;  %s2353_s23 = scalar_lea.hbm %s2937_s17, %s1004_s7 }
  0xdf   : > { %s1422_s10 = scalar_lea.hbm %s2353_s23, 16  ;;  %s1427_s1 = scalar_lea.hbm %s2938_s2, 512 }
  0xe0   : > { %p1423_p10 = scmp.ne.s32.totalorder %s2353_s23, %s1422_s10  ;;  %p1428_p4 = scmp.lt.u32.totalorder %s2353_s23, %s2938_s2 }
  0xe1   : > { %p1429_p1 = scmp.lt.u32.totalorder %s1427_s1, %s1422_s10  ;;  %p1431_p0 = scmp.lt.u32.totalorder %s1422_s10, %s2353_s23 }
  0xe2   : > { %p1425_p3 = pnand %p1424_p12, %p1423_p10 }
  0xe3   : > { %p1430_p13 = por %p1429_p1, %p1428_p4 }
  0xe4   : > { %p1426_p7 = pneg %p1425_p3 }
  0xe5   : > { %p1432_p11 = por %p1431_p0, %p1430_p13 }
  0xe7   : > { %p1433_p5 = pnand %p1432_p11, %p1426_p7 }
  0xe9   : > { %1436 = shalt.err (!%p1433_p5)
}
  0xea   : > { %s1437_s7 = scalar_lea.vmem %s2344_s21, 16  ;;  %s1824_s15 = smov [#allocation5]  }
  0xeb   : > { %p1438_p10 = scmp.ne.s32.totalorder %s2344_s21, %s1437_s7  ;;  %s1442_s3 = sshll.u32 %s1824_s15, 4  ;;  %s1443_s3 = int_to_ptr.vmem [resolvable:$false] %s1442_s3 }
  0xec   : > { %s1444_s24 = scalar_lea.vmem %s1443_s3, 32  ;;  %p1445_p6 = scmp.lt.s32.totalorder %s2344_s21, %s1443_s3 }
  0xed   : > { %p1440_p3 = pnand %p1438_p10, %p1424_p12  ;;  %p1446_p4 = scmp.lt.s32.totalorder %s1444_s24, %s1437_s7 }
  0xef   : > { %p1441_p8 = pneg %p1440_p3  ;;  %p1447_p1 = por %p1446_p4, %p1445_p6 }
  0xf1   : > { %p1448_p13 = pnand %p1447_p1, %p1441_p8 }
  0xf3   : > { %1451 = shalt.err (!%p1448_p13)
}
  0xf4   : > { %1066 = dma.hbm_to_vmem [thread:$0]  (!%p2326_p9), %s2353_s23, 16, %s2344_s21, %s385_s27  }
  0xf5   : > { %p2939_p6 = scmp.eq.s32.totalorder %s1818_s4, 0  ;;  %p2940_p8 = scmp.ne.s32.totalorder %s2931_s12, %s2930_s22 }
  0xf6   : > { %p2942_p12 = scmp.eq.s32.totalorder %s2021_s19, 0  ;;  %p2943_p7 = scmp.ne.s32.totalorder %s2930_s22, %s2934_s8 }
  0xf7   : > { %p2387_p5 = por %p2940_p8, %p2939_p6  ;;  %s141_s0 = sadd.s32 1, %s2931_s12 }
  0xf8   : > { %p2396_p0 = por %p2943_p7, %p2942_p12  ;;  %s429_s23 = sand.u32 1, %s2931_s12  }
  0xf9   : > { %s138_s21 = ssub.s32 %s2341_s5, %s2346_s11  ;;  %s2945_s27 = sld [smem:[#allocation50_spill]] }
  0xfa   : > { %s2944_s10 = scalar_select %p2396_p0, 1, 0 }
  0xfb   : > { %p139_p9 = scmp.eq.s32.totalorder %s138_s21, 0  ;;  %s2946_s1 = sld [smem:[#allocation51_spill]] }
  0xfc   : > { %s1037_s17 = scalar_select %p2387_p5, [#allocation4], [#allocation20] }
  0xfd   : > { %s3070_s12 = smov (!%p139_p9, %s2931_s12), %s141_s0  ;;  %s2948_s22 = sld [smem:[#allocation49_spill]] }
  0xfe   : > { %2947 = sst [smem:[#allocation71_spill]] %s3070_s12  ;;  %s3072_s18 = smov (!%p2387_p5, %s131_s18), 0 }
  0xff   : > { %p2949_p11 = scmp.lt.s32.totalorder %s1818_s4, 2  ;;  %s430_s8 = scalar_lea.vmem [#allocation10], %s429_s23 }
 0x100   : > { %s442_s13 = sshll.u32 %s430_s8, 4  ;;  %s203_s7 = sadd.s32 4, %s2026_s25  ;;  %s2431_s13 = int_to_ptr.vmem [resolvable:$true] %s442_s13 }
 0x101   : > { %s3074_s17 = smov (!%p2949_p11, %s1037_s17), [#allocation27]  ;;  %p2950_p10 = pmov %p2949_p11 }
 0x102   : > { %s2428_s15 = sld [smem:[#allocation4 + %s203_s7]]  ;;  %s208_s3 = sadd.s32 4, %s2035_s30 }
 0x103   : > { %s3076_s18 = smov (!%p2950_p10, %s3072_s18), 0  ;;  %p2951_p3 = pmov %p2950_p10 }
 0x104   : > { %s435_s11 = sld [smem:[%s3074_s17 + %s3076_s18]] }
 0x105   : > { %p2421_p4 = pnand %p2951_p3, %p2387_p5  ;;  %s2433_s24 = sld [smem:[#allocation4 + %s208_s3]] }
 0x106   : > { %s2953_s21 = sld [smem:[#allocation74_spill]] }
 0x107   : > { %p1454_p8 = pneg %p2421_p4 }
 0x10a   : > { %s1008_s0 = sshll.u32 %s435_s11, 4 }
 0x10c   : > { %s2954_s2 = smov %s2953_s21  ;;  %s2440_s8 = scalar_lea.hbm %s2953_s21, %s1008_s0 }
 0x10d   : > { %s1452_s18 = scalar_lea.hbm %s2440_s8, 16  ;;  %s1457_s3 = scalar_lea.hbm %s2954_s2, 512 }
 0x10e   : > { %p1453_p6 = scmp.ne.s32.totalorder %s2440_s8, %s1452_s18  ;;  %p1458_p7 = scmp.lt.u32.totalorder %s2440_s8, %s2954_s2 }
 0x10f   : > { %p1459_p9 = scmp.lt.u32.totalorder %s1457_s3, %s1452_s18  ;;  %p1461_p10 = scmp.lt.u32.totalorder %s1452_s18, %s2440_s8 }
 0x110   : > { %p1455_p5 = pnand %p1454_p8, %p1453_p6 }
 0x111   : > { %p1460_p11 = por %p1459_p9, %p1458_p7 }
 0x112   : > { %p1456_p12 = pneg %p1455_p5 }
 0x113   : > { %p1462_p3 = por %p1461_p10, %p1460_p11 }
 0x115   : > { %p1463_p13 = pnand %p1462_p3, %p1456_p12 }
 0x117   : > { %1466 = shalt.err (!%p1463_p13)
}
 0x118   : > { %s1467_s23 = scalar_lea.vmem %s2431_s13, 16  ;;  %s1825_s21 = smov [#allocation10]  }
 0x119   : > { %p1468_p6 = scmp.ne.s32.totalorder %s2431_s13, %s1467_s23  ;;  %s1472_s17 = sshll.u32 %s1825_s21, 4  ;;  %s1473_s17 = int_to_ptr.vmem [resolvable:$false] %s1472_s17 }
 0x11a   : > { %s1474_s11 = scalar_lea.vmem %s1473_s17, 32  ;;  %p1475_p0 = scmp.lt.s32.totalorder %s2431_s13, %s1473_s17 }
 0x11b   : > { %p1470_p5 = pnand %p1468_p6, %p1454_p8  ;;  %p1476_p7 = scmp.lt.s32.totalorder %s1474_s11, %s1467_s23 }
 0x11d   : > { %p1471_p1 = pneg %p1470_p5  ;;  %p1477_p9 = por %p1476_p7, %p1475_p0 }
 0x11f   : > { %p1478_p11 = pnand %p1477_p9, %p1471_p1 }
 0x121   : > { %1481 = shalt.err (!%p1478_p11)
}
 0x122   : > { %s2955_s18 = scalar_lea.sflag [#allocation9], %s2078_s26  ;;  %p2956_p0 = scmp.eq.s32.totalorder %s1818_s4, 0 }
 0x123   : > { %1076 = dma.hbm_to_vmem [thread:$0]  (!%p2421_p4), %s2440_s8, 16, %s2431_s13, %s2955_s18  }
 0x124   : > { %p2957_p1 = scmp.ne.s32.totalorder %s2946_s1, %s2945_s27  ;;  %p2959_p8 = scmp.eq.s32.totalorder %s2021_s19, 0 }
 0x125   : > { %p2960_p12 = scmp.ne.s32.totalorder %s2945_s27, %s2948_s22  ;;  %s213_s29 = sadd.s32 1, %s2946_s1 }
 0x126   : > { %p2476_p13 = por %p2957_p1, %p2956_p0  ;;  %s473_s13 = sand.u32 1, %s2946_s1  }
 0x127   : > { %p2485_p10 = por %p2960_p12, %p2959_p8  ;;  %s210_s8 = ssub.s32 %s2428_s15, %s2433_s24 }
 0x128   : > { %p211_p4 = scmp.eq.s32.totalorder %s210_s8, 0  ;;  %s2962_s0 = sld [smem:[#allocation45_spill]] }
 0x129   : > { %s2961_s3 = scalar_select %p2485_p10, 1, 0 }
 0x12a   : > { %s2963_s23 = sld [smem:[#allocation46_spill]]  ;;  %s3078_s1 = smov (!%p211_p4, %s2946_s1), %s213_s29 }
 0x12b   : > { %s1043_s21 = scalar_select %p2476_p13, [#allocation4], [#allocation22] }
 0x12c   : > { %s2964_s27 = sld [smem:[#allocation44_spill]]  ;;  %s3080_s7 = smov (!%p2476_p13, %s203_s7), 0 }
 0x12d   : > { %p2965_p3 = scmp.lt.s32.totalorder %s1818_s4, 2  ;;  %s474_s22 = scalar_lea.vmem [#allocation13], %s473_s13 }
 0x12e   : > { %s486_s17 = sshll.u32 %s474_s22, 4  ;;  %s275_s11 = sadd.s32 6, %s2026_s25  ;;  %s2520_s17 = int_to_ptr.vmem [resolvable:$true] %s486_s17 }
 0x12f   : > { %s3082_s21 = smov (!%p2965_p3, %s1043_s21), [#allocation29]  ;;  %p2966_p6 = pmov %p2965_p3 }
 0x130   : > { %p2967_p5 = pmov %p2965_p3  ;;  %s2517_s18 = sld [smem:[#allocation4 + %s275_s11]] }
 0x131   : > { %s3084_s7 = smov (!%p2966_p6, %s3080_s7), 0  ;;  %s280_s29 = sadd.s32 6, %s2035_s30 }
 0x132   : > { %p2510_p7 = pnand %p2967_p5, %p2476_p13  ;;  %s479_s24 = sld [smem:[%s3082_s21 + %s3084_s7]] }
 0x133   : > { %s2522_s8 = sld [smem:[#allocation4 + %s280_s29]] }
 0x134   : > { %s2969_s2 = sld [smem:[#allocation76_spill]]  ;;  %p1484_p1 = pneg %p2510_p7 }
 0x138   : > { %s1012_s13 = sshll.u32 %s479_s24, 4 }
 0x13a   : > { %s2529_s12 = scalar_lea.hbm %s2969_s2, %s1012_s13  ;;  %s1487_s24 = scalar_lea.hbm %s2969_s2, 512 }
 0x13b   : > { %s1482_s7 = scalar_lea.hbm %s2529_s12, 16  ;;  %p1488_p12 = scmp.lt.u32.totalorder %s2529_s12, %s2969_s2 }
 0x13c   : > { %p1483_p0 = scmp.ne.s32.totalorder %s2529_s12, %s1482_s7  ;;  %p1489_p4 = scmp.lt.u32.totalorder %s1487_s24, %s1482_s7 }
 0x13d   : > { %p1491_p6 = scmp.lt.u32.totalorder %s1482_s7, %s2529_s12 }
 0x13e   : > { %p1485_p13 = pnand %p1484_p1, %p1483_p0  ;;  %p1490_p3 = por %p1489_p4, %p1488_p12 }
 0x140   : > { %p1486_p8 = pneg %p1485_p13  ;;  %p1492_p5 = por %p1491_p6, %p1490_p3 }
 0x142   : > { %p1493_p11 = pnand %p1492_p5, %p1486_p8 }
 0x144   : > { %1496 = shalt.err (!%p1493_p11)
}
 0x145   : > { %s1497_s5 = scalar_lea.vmem %s2520_s17, 16  ;;  %s1826_s22 = smov [#allocation13]  }
 0x146   : > { %p1498_p0 = scmp.ne.s32.totalorder %s2520_s17, %s1497_s5  ;;  %s1502_s30 = sshll.u32 %s1826_s22, 4  ;;  %s1503_s30 = int_to_ptr.vmem [resolvable:$false] %s1502_s30 }
 0x147   : > { %s1504_s21 = scalar_lea.vmem %s1503_s30, 32  ;;  %p1505_p10 = scmp.lt.s32.totalorder %s2520_s17, %s1503_s30 }
 0x148   : > { %p1500_p13 = pnand %p1498_p0, %p1484_p1  ;;  %p1506_p12 = scmp.lt.s32.totalorder %s1504_s21, %s1497_s5 }
 0x14a   : > { %p1501_p9 = pneg %p1500_p13  ;;  %p1507_p4 = por %p1506_p12, %p1505_p10 }
 0x14c   : > { %p1508_p3 = pnand %p1507_p4, %p1501_p9 }
 0x14e   : > { %1511 = shalt.err (!%p1508_p3)
}
 0x14f   : > { %s2970_s7 = scalar_lea.sflag [#allocation12], %s2078_s26  ;;  %p2971_p10 = scmp.eq.s32.totalorder %s1818_s4, 0 }
 0x150   : > { %1086 = dma.hbm_to_vmem [thread:$0]  (!%p2510_p7), %s2529_s12, 16, %s2520_s17, %s2970_s7  }
 0x151   : > { %p2972_p9 = scmp.ne.s32.totalorder %s2963_s23, %s2962_s0  ;;  %p2973_p1 = scmp.eq.s32.totalorder %s2021_s19, 0 }
 0x152   : > { %p2974_p8 = scmp.ne.s32.totalorder %s2962_s0, %s2964_s27  ;;  %s282_s24 = ssub.s32 %s2517_s18, %s2522_s8 }
 0x153   : > { %p294_p11 = por %p2972_p9, %p2971_p10  ;;  %s285_s29 = sadd.s32 1, %s2963_s23 }
 0x154   : > { %p2570_p6 = por %p2974_p8, %p2973_p1  ;;  %p283_p5 = scmp.eq.s32.totalorder %s282_s24, 0 }
 0x155   : > { %s517_s13 = sand.u32 1, %s2963_s23   ;;  %s3088_s11 = smov (!%p294_p11, %s275_s11), 0 }
 0x156   : > { %s2975_s15 = scalar_select %p2570_p6, 1, 0 }
 0x157   : > { %s1049_s5 = scalar_select %p294_p11, [#allocation4], [#allocation24] }
 0x158   : > { %s3086_s23 = smov (!%p283_p5, %s2963_s23), %s285_s29  ;;  %p2976_p0 = scmp.lt.s32.totalorder %s1818_s4, 2 }
 0x159   : > { %s518_s27 = scalar_lea.vmem [#allocation16], %s517_s13  ;;  %s2980_s22 = sld [smem:[#allocation78_spill]] }
 0x15a   : > { %s3090_s5 = smov (!%p2976_p0, %s1049_s5), [#allocation31]  ;;  %p2977_p7 = pmov %p2976_p0 }
 0x15b   : > { %p2978_p13 = pmov %p2976_p0  ;;  %s530_s17 = sshll.u32 %s518_s27, 4  ;;  %s2593_s17 = int_to_ptr.vmem [resolvable:$true] %s530_s17 }
 0x15c   : > { %s3092_s11 = smov (!%p2977_p7, %s3088_s11), 0 }
 0x15d   : > { %p2589_p12 = pnand %p2978_p13, %p294_p11  ;;  %s523_s0 = sld [smem:[%s3090_s5 + %s3092_s11]] }
 0x15f   : > { %s2981_s7 = smov %s2980_s22  ;;  %p1514_p3 = pneg %p2589_p12 }
 0x160   : > { %s1517_s11 = scalar_lea.hbm %s2981_s7, 512 }
 0x163   : > { %s1016_s18 = sshll.u32 %s523_s0, 4 }
 0x164   : > { %s528_s30 = scalar_lea.hbm %s2980_s22, %s1016_s18 }
 0x165   : > { %s1512_s21 = scalar_lea.hbm %s528_s30, 16  ;;  %p1518_p11 = scmp.lt.u32.totalorder %s528_s30, %s2981_s7 }
 0x166   : > { %p1513_p4 = scmp.ne.s32.totalorder %s528_s30, %s1512_s21  ;;  %p1519_p1 = scmp.lt.u32.totalorder %s1517_s11, %s1512_s21 }
 0x167   : > { %p1521_p5 = scmp.lt.u32.totalorder %s1512_s21, %s528_s30 }
 0x168   : > { %p1515_p10 = pnand %p1514_p3, %p1513_p4  ;;  %p1520_p8 = por %p1519_p1, %p1518_p11 }
 0x16a   : > { %p1516_p9 = pneg %p1515_p10  ;;  %p1522_p0 = por %p1521_p5, %p1520_p8 }
 0x16c   : > { %p1523_p7 = pnand %p1522_p0, %p1516_p9 }
 0x16e   : > { %1526 = shalt.err (!%p1523_p7)
}
 0x16f   : > { %s1527_s0 = scalar_lea.vmem %s2593_s17, 16  ;;  %s1827_s27 = smov [#allocation16]  }
 0x170   : > { %p1528_p13 = scmp.ne.s32.totalorder %s2593_s17, %s1527_s0  ;;  %s1532_s18 = sshll.u32 %s1827_s27, 4  ;;  %s1533_s18 = int_to_ptr.vmem [resolvable:$false] %s1532_s18 }
 0x171   : > { %s1534_s8 = scalar_lea.vmem %s1533_s18, 32  ;;  %p1535_p6 = scmp.lt.s32.totalorder %s2593_s17, %s1533_s18 }
 0x172   : > { %p1530_p4 = pnand %p1528_p13, %p1514_p3  ;;  %p1536_p11 = scmp.lt.s32.totalorder %s1534_s8, %s1527_s0 }
 0x174   : > { %p1531_p10 = pneg %p1530_p4  ;;  %p1537_p1 = por %p1536_p11, %p1535_p6 }
 0x176   : > { %p1538_p8 = pnand %p1537_p1, %p1531_p10 }
 0x178   : > { %1541 = shalt.err (!%p1538_p8)
}
 0x179   : > { %s2982_s25 = scalar_lea.sflag [#allocation15], %s2078_s26  ;;  %555 = sbr.rel (%p2101_p2) target bundleno = 470 (0x1d6), region = 52 }
 0x17a   : > { %1096 = dma.hbm_to_vmem [thread:$0]  (!%p2589_p12), %s528_s30, 16, %s2593_s17, %s2982_s25  }
 0x17b   : > { %s557_s22 = sand.u32 (!%p2101_p2), 1, %s1802_s9   ;;  %p2983_p3 = scmp.ne.s32.totalorder (!%p2101_p2), %s2928_s6, 0 }
 0x17c   : > { %s558_s21 = scalar_lea.sflag (!%p2101_p2), [#allocation6], %s557_s22  ;;  %s2623_s24 = scalar_lea.vmem (!%p2101_p2), [#allocation5], %s557_s22 }
 0x180   : > { %1681 = dma.done.wait (%p2983_p3), %s558_s21, 16  }
 0x181   : > { %1683 = vsyncadd (%p2983_p3), %s558_s21, 4294967280  ;;  %s2984_s12 = sld [smem:[#allocation62_spill]]  ;;  %s565_s26 = sand.u32 1, %s2021_s19  }
 0x182   : > { %s567_s29 = sand.u32 1, %s1790_s14   ;;  %s566_s17 = scalar_lea.sflag [#allocation9], %s565_s26 }
 0x183   : > { %s2631_s30 = scalar_lea.vmem [#allocation8], %s567_s29 }
 0x187   : > { %p2985_p2 = scmp.ne.s32.totalorder %s2984_s12, 0 }
 0x189   : > { %1685 = dma.done.wait (%p2985_p2), %s566_s17, 16  }
 0x18a   : > { %1687 = vsyncadd (%p2985_p2), %s566_s17, 4294967280  ;;  %s2986_s20 = sld [smem:[#allocation54_spill]]  ;;  %p2987_p6 = scmp.ne.s32.totalorder %s2944_s10, 0 }
 0x190   : > { %s575_s11 = sand.u32 1, %s2986_s20  }
 0x191   : > { %s576_s13 = scalar_lea.vmem [#allocation10], %s575_s11 }
 0x192   : > { %1689 = dma.done.wait (%p2987_p6), %s566_s17, 16  }
 0x193   : > { %1691 = vsyncadd (%p2987_p6), %s566_s17, 4294967280  ;;  %s583_s19 = sand.u32 1, %s1766_s28   ;;  %s582_s6 = scalar_lea.sflag [#allocation12], %s565_s26 }
 0x194   : > { %s584_s5 = scalar_lea.vmem [#allocation11], %s583_s19  ;;  %p2988_p12 = scmp.ne.s32.totalorder %s2901_s16, 0 }
 0x196   : > { %1693 = dma.done.wait (%p2988_p12), %s582_s6, 16  }
 0x197   : > { %1695 = vsyncadd (%p2988_p12), %s582_s6, 4294967280  ;;  %s2989_s0 = sld [smem:[#allocation50_spill]]  ;;  %p2990_p9 = scmp.ne.s32.totalorder %s2961_s3, 0 }
 0x19d   : > { %s591_s27 = sand.u32 1, %s2989_s0  }
 0x19e   : > { %s592_s18 = scalar_lea.vmem [#allocation13], %s591_s27 }
 0x19f   : > { %1697 = dma.done.wait (%p2990_p9), %s582_s6, 16  }
 0x1a0   : > { %1699 = vsyncadd (%p2990_p9), %s582_s6, 4294967280  ;;  %s2991_s10 = sld [smem:[#allocation47_spill]]  ;;  %s2992_s8 = sld [smem:[#allocation68_spill]] }
 0x1a1   : > { %s598_s22 = scalar_lea.sflag [#allocation15], %s565_s26 }
 0x1a6   : > { %s599_s25 = sand.u32 1, %s2991_s10   ;;  %p2993_p5 = scmp.ne.s32.totalorder %s2992_s8, 0 }
 0x1a7   : > { %s600_s21 = scalar_lea.vmem [#allocation14], %s599_s25 }
 0x1a8   : > { %1701 = dma.done.wait (%p2993_p5), %s598_s22, 16  }
 0x1a9   : > { %1703 = vsyncadd (%p2993_p5), %s598_s22, 4294967280  ;;  %s2994_s16 = sld [smem:[#allocation45_spill]]  ;;  %p2995_p0 = scmp.ne.s32.totalorder %s2975_s15, 0 }
 0x1af   : > { %s607_s12 = sand.u32 1, %s2994_s16  }
 0x1b0   : > { %s608_s29 = scalar_lea.vmem [#allocation16], %s607_s12 }
 0x1b1   : > { %1705 = dma.done.wait (%p2995_p0), %s598_s22, 16  }
 0x1b2   : > { %1707 = vsyncadd (%p2995_p0), %s598_s22, 4294967280  ;;  %s2996_s3 = sld [smem:[#allocation42_spill]]  ;;  %s2997_s17 = sld [smem:[#allocation59_spill]]  ;;  %v720_v0 = vld [vmem:[%s2623_s24] sm:$0x1] }
 0x1b3   : > { %v723_v1 = vld [vmem:[%s2631_s30] sm:$0x1]  ;;  %s2998_s15 = sld [smem:[#allocation64_spill]]  ;;  %s1828_s12 = smov [#allocation17]  }
 0x1b4   : > { %v727_v2 = vld [vmem:[%s576_s13] sm:$0x1]  ;;  %s2999_s13 = sld [smem:[#allocation80_spill]] }
 0x1b5   : > { %v731_v3 = vld [vmem:[%s584_s5] sm:$0x1]  ;;  %s3001_s5 = sld [smem:[#allocation79_spill]] }
 0x1b6   : > { %v735_v4 = vld [vmem:[%s592_s18] sm:$0x1] }
 0x1b7   : > { %v739_v5 = vld [vmem:[%s600_s21] sm:$0x1] }
 0x1b8   : > { %s669_s26 = sand.u32 1, %s2996_s3   ;;  %s1019_s20 = sshll.u32 %s2997_s17, 3  ;;  %v743_v6 = vld [vmem:[%s608_s29] sm:$0x1] }
 0x1b9   : > { %s1018_s11 = sshll.u32 %s669_s26, 3  ;;  %s709_s19 = sadd.s32 7, %s1019_s20 }
 0x1ba   : > { %s710_s6 = sld [smem:[#allocation4 + %s709_s19]]  ;;  %s671_s0 = scalar_lea.vmem [#allocation17], %s1018_s11 }
 0x1bb   : > { %722 = vst [vmem:[%s671_s0] sm:$0x1] %v720_v0  ;;  %1020 = vst [vmem:[%s671_s0 + $0x1] sm:$0x1] %v723_v1  ;;  %s1028_s27 = sshll.u32 %s2997_s17, 7  ;;  %s765_s10 = sshll.u32 %s671_s0, 4  ;;  %s2675_s10 = int_to_ptr.vmem [resolvable:$true] %s765_s10 }
 0x1bc   : > { %1021 = vst [vmem:[%s671_s0 + $0x2] sm:$0x1] %v727_v2  ;;  %1022 = vst [vmem:[%s671_s0 + $0x3] sm:$0x1] %v731_v3  ;;  %s3000_s3 = smov %s2999_s13  ;;  %s2670_s8 = scalar_lea.hbm %s2999_s13, %s1028_s27 }
 0x1bd   : > { %1023 = vst [vmem:[%s671_s0 + $0x4] sm:$0x1] %v735_v4  ;;  %1024 = vst [vmem:[%s671_s0 + $0x5] sm:$0x1] %v739_v5  ;;  %s752_s21 = scalar_lea.sflag [#allocation7], %s669_s26  ;;  %s1542_s16 = scalar_lea.vmem %s2675_s10, 128 }
 0x1be   : > { %1025 = vst [vmem:[%s671_s0 + $0x6] sm:$0x1] %v743_v6  ;;  %p1543_p13 = scmp.ne.s32.totalorder %s2675_s10, %s1542_s16  ;;  %p3002_p4 = scmp.ne.s32.totalorder %s2998_s15, 0 }
 0x1bf   : > { %s1546_s29 = sshll.u32 %s1828_s12, 4  ;;  %s1547_s29 = int_to_ptr.vmem [resolvable:$false] %s1546_s29 }
 0x1c0   : > { %p711_p7 = scmp.lt.s32.totalorder %s710_s6, 31  ;;  %p1544_p10 = pnand %p1543_p13, %p3002_p4 }
 0x1c1   : > { %s1548_s17 = scalar_lea.vmem %s1547_s29, 256  ;;  %p1549_p1 = scmp.lt.s32.totalorder %s2675_s10, %s1547_s29 }
 0x1c2   : > { %s3094_s6 = smov (!%p711_p7, %s710_s6), 31  ;;  %p1545_p11 = pneg %p1544_p10 }
 0x1c3   : > { %s713_s18 = scalar_lea.vmem %s3001_s5, %s3094_s6  ;;  %p1550_p8 = scmp.lt.s32.totalorder %s1548_s17, %s1542_s16 }
 0x1c4   : > { %v747_v7 = vld [vmem:[%s713_s18] sm:$0x1] }
 0x1c5   : > { %1026 = vst [vmem:[%s671_s0 + $0x7] sm:$0x1] %v747_v7  ;;  %p1551_p3 = por %p1550_p8, %p1549_p1 }
 0x1c7   : > { %p1552_p2 = pnand %p1551_p3, %p1545_p11 }
 0x1c9   : > { %1555 = shalt.err (!%p1552_p2)
}
 0x1ca   : > { %s1556_s26 = scalar_lea.hbm %s2670_s8, 128  ;;  %s1560_s19 = scalar_lea.hbm %s3000_s3, 256 }
 0x1cb   : > { %p1557_p6 = scmp.ne.s32.totalorder %s2670_s8, %s1556_s26  ;;  %p1561_p5 = scmp.lt.u32.totalorder %s2670_s8, %s3000_s3 }
 0x1cc   : > { %p1562_p0 = scmp.lt.u32.totalorder %s1560_s19, %s1556_s26  ;;  %p1564_p13 = scmp.lt.u32.totalorder %s1556_s26, %s2670_s8 }
 0x1cd   : > { %p1558_p12 = pnand %p1557_p6, %p3002_p4 }
 0x1ce   : > { %p1563_p7 = por %p1562_p0, %p1561_p5 }
 0x1cf   : > { %p1559_p9 = pneg %p1558_p12 }
 0x1d0   : > { %p1565_p10 = por %p1564_p13, %p1563_p7 }
 0x1d2   : > { %p1566_p11 = pnand %p1565_p10, %p1559_p9 }
 0x1d4   : > { %1569 = shalt.err (!%p1566_p11)
}
 0x1d5   : > { %1059 = dma.vmem_to_hbm [thread:$0]  (%p3002_p4), %s2675_s10, 128, %s2670_s8, %s752_s21  }
 0x1d6 PF: > { %s3003_s27 = sld [smem:[#allocation41_spill]]  ;;  %p3006_p8 = scmp.ge.s32.totalorder %s1818_s4, 2 }
 0x1d7   : > { %s3004_s24 = sld [smem:[#allocation65_spill]] }
 0x1dc   : > { %s777_s30 = sand.u32 1, %s3003_s27  }
 0x1dd   : > { %p3005_p1 = scmp.ne.s32.totalorder %s3004_s24, 0  ;;  %s778_s13 = scalar_lea.sflag [#allocation7], %s777_s30 }
 0x1df   : > { %p1098_p3 = pnand %p3006_p8, %p3005_p1 }
 0x1e1   : > { %1709 = dma.done.wait (!%p1098_p3), %s778_s13, 128  }
 0x1e2   : > { %1711 = vsyncadd (!%p1098_p3), %s778_s13, 4294967168  ;;  %s42_s4 = sadd.s32 1, %s1818_s4   ;;  %s3009_s15 = sld [smem:[#allocation42_spill]] }
 0x1e3   : > { %p2704_p2 = scmp.ge.s32.totalorder %s42_s4, 4   ;;  %s3010_s17 = sld [smem:[#allocation43_spill]] }
 0x1e4   : > { %s3011_s18 = sld [smem:[#allocation63_spill]]  ;;  %s3012_s19 = sld [smem:[#allocation45_spill]] }
 0x1e5   : > { %s3013_s20 = sld [smem:[#allocation46_spill]]  ;;  %s3014_s22 = sld [smem:[#allocation47_spill]] }
 0x1e6   : > { %s3015_s10 = sld [smem:[#allocation48_spill]]  ;;  %s3016_s24 = sld [smem:[#allocation69_spill]] }
 0x1e7   : > { %s3017_s25 = sld [smem:[#allocation50_spill]]  ;;  %s3018_s0 = sld [smem:[#allocation51_spill]] }
 0x1e8   : > { %s3019_s8 = smov %s3078_s1  ;;  %s3020_s16 = sld [smem:[#allocation52_spill]] }
 0x1e9   : > { %s3021_s29 = sld [smem:[#allocation67_spill]]  ;;  %s3023_s1 = smov %s3009_s15 }
 0x1ea   : > { %s3022_s30 = sld [smem:[#allocation54_spill]]  ;;  %s3024_s11 = sld [smem:[#allocation55_spill]] }
 0x1eb   : > { %s3025_s12 = sld [smem:[#allocation71_spill]]  ;;  %s3026_s6 = sld [smem:[#allocation56_spill]] }
 0x1ec   : > { %s3027_s15 = sld [smem:[#allocation66_spill]]  ;;  %s3028_s21 = smov %s3086_s23 }
 0x1ed   : > { %s3029_s2 = sld [smem:[#allocation58_spill]]  ;;  %s3030_s23 = smov %s3015_s10 }
 0x1ee   : > { %s3031_s10 = sld [smem:[#allocation70_spill]]  ;;  %s3032_s3 = sld [smem:[#allocation60_spill]] }
 0x1ef   : > { %s3033_s7 = sld [smem:[#allocation61_spill]]  ;;  %s3034_s26 = smov %s3019_s8 }
 0x1f0   : > { %s3035_s27 = smov %s1766_s28  ;;  %s3036_s28 = smov %s3020_s16 }
 0x1f1   : > { %s3037_s13 = smov %s1790_s14  ;;  %s3038_s14 = smov %s3026_s6 }
 0x1f2   : > { %s3039_s16 = smov %s1802_s9  ;;  %41 = sbr.rel (!%p2704_p2) target bundleno = 40 (0x28), region = 180 }
 0x1f3   : > { %s3040_s9 = smov %s3029_s2 }
 0x1f4   : > { %s3041_s8 = smov %s3032_s3 }
 0x1f5   : > { %s3042_s6 = smov %s3033_s7 }
 0x1f9   :  { %783 = vsyncpa [#allocation6], 1 }
 0x1fa   :  { %785 = vsyncpa [#allocation6 + $0x1], 1 }
 0x1fb   :  { %786 = vsyncpa [#allocation9], 1 }
 0x1fc   :  { %788 = vsyncpa [#allocation9 + $0x1], 1 }
 0x1fd   :  { %789 = vsyncpa [#allocation12], 1 }
 0x1fe   :  { %791 = vsyncpa [#allocation12 + $0x1], 1 }
 0x1ff   :  { %792 = vsyncpa [#allocation15], 1 }
 0x200   :  { %794 = vsyncpa [#allocation15 + $0x1], 1 }
 0x201   :  { %795 = vsyncpa [#allocation7], 1 }
 0x202   :  { %797 = vsyncpa [#allocation7 + $0x1], 1 }

</bundles_post_ra>
